<compile_context>
chip_gen: v6e
topology: v6e:2x2x1
jax: 0.10.0
libtpu: 0.0.40
codegen_flags: <defaults>
</compile_context>

<pallas_src>
import functools

import jax
import jax.numpy as jnp
from jax import lax
from jax.experimental import pallas as pl
from jax.experimental.pallas import tpu as pltpu


_VMEM_LIMIT = 48 * 1024 * 1024  # above default scoped limit, < v7x 64 MiB physical


# ----------------------------------------------------------------------------
# tile selection
# ----------------------------------------------------------------------------
def _choose_tm(M):
    return 512 if M >= 512 else M            # large, lane/sublane friendly M tiles


def _choose_tn(Nout):
    if Nout % 256 == 0:                      # match 2x256x256 MXU on v6e/v7x
        return 256
    if Nout % 128 == 0:
        return 128
    return Nout                              # small channel counts stay full-width


def _choose_tk(K, max_tk=1024):
    """Largest K tile <= max_tk that exactly divides K (prefer 128-multiples)."""
    if K <= max_tk:
        return K
    for t in range(max_tk - max_tk % 128, 0, -128):
        if K % t == 0:
            return t
    for t in range(max_tk, 0, -1):
        if K % t == 0:
            return t
    return K


# ----------------------------------------------------------------------------
# fused matmul + bias (+ residual) (+ ReLU) kernels  (1x1 convs, classifier)
# ----------------------------------------------------------------------------
# --- single K-tile variants (no accumulator scratch, no k grid axis) --------
def _mm_kernel_k1(x_ref, w_ref, b_ref, o_ref, *, relu):
    out = jnp.dot(x_ref[...], w_ref[...],
                  preferred_element_type=jnp.float32) + b_ref[...]
    if relu:
        out = jnp.maximum(out, 0.0)
    o_ref[...] = out.astype(o_ref.dtype)


def _mm_res_kernel_k1(x_ref, w_ref, b_ref, r_ref, o_ref, *, relu):
    out = (jnp.dot(x_ref[...], w_ref[...], preferred_element_type=jnp.float32)
           + b_ref[...] + r_ref[...].astype(jnp.float32))
    if relu:
        out = jnp.maximum(out, 0.0)
    o_ref[...] = out.astype(o_ref.dtype)


# --- K-tiled variants (f32 VMEM accumulator, bias folded into init) ---------
def _mm_kernel(x_ref, w_ref, b_ref, o_ref, acc_ref, *, relu):
    k = pl.program_id(2)

    @pl.when(k == 0)
    def _():
        acc_ref[...] = jnp.broadcast_to(b_ref[...], acc_ref.shape)

    acc_ref[...] += jnp.dot(x_ref[...], w_ref[...],
                            preferred_element_type=jnp.float32)

    @pl.when(k == pl.num_programs(2) - 1)
    def _():
        out = acc_ref[...]
        if relu:
            out = jnp.maximum(out, 0.0)
        o_ref[...] = out.astype(o_ref.dtype)


def _mm_res_kernel(x_ref, w_ref, b_ref, r_ref, o_ref, acc_ref, *, relu):
    k = pl.program_id(2)

    @pl.when(k == 0)
    def _():
        acc_ref[...] = jnp.broadcast_to(b_ref[...], acc_ref.shape)

    acc_ref[...] += jnp.dot(x_ref[...], w_ref[...],
                            preferred_element_type=jnp.float32)

    @pl.when(k == pl.num_programs(2) - 1)
    def _():
        out = acc_ref[...] + r_ref[...].astype(jnp.float32)
        if relu:
            out = jnp.maximum(out, 0.0)
        o_ref[...] = out.astype(o_ref.dtype)


def matmul_bias_act(x2d, w, bias, residual=None, relu=True,
                    out_dtype=jnp.bfloat16):
    """(M,K)@(K,N) + bias (+ residual) (+ ReLU); bf16 MXU, f32 accumulation."""
    M, K = x2d.shape
    Kw, Nout = w.shape
    assert K == Kw
    x2d = x2d.astype(jnp.bfloat16)
    w = w.astype(jnp.bfloat16)
    b2 = bias.reshape(1, Nout).astype(jnp.float32)

    TM, TN, TK = _choose_tm(M), _choose_tn(Nout), _choose_tk(K)
    assert K % TK == 0, (K, TK)
    gm, gn, gk = pl.cdiv(M, TM), pl.cdiv(Nout, TN), K // TK

    flops = 2 * M * K * Nout
    bytes_accessed = 2 * (M * K + K * Nout * gm + M * Nout) + 4 * Nout
    if residual is not None:
        bytes_accessed += 2 * M * Nout
        residual = residual.astype(jnp.bfloat16)

    if gk == 1:
        # K fits in a single tile: no accumulator round-trip, 2-D grid.
        in_specs = [
            pl.BlockSpec((TM, K), lambda i, j: (i, 0)),
            pl.BlockSpec((K, TN), lambda i, j: (0, j)),
            pl.BlockSpec((1, TN), lambda i, j: (0, j)),
        ]
        args = [x2d, w, b2]
        if residual is None:
            kernel = functools.partial(_mm_kernel_k1, relu=relu)
        else:
            in_specs.append(pl.BlockSpec((TM, TN), lambda i, j: (i, j)))
            args.append(residual)
            kernel = functools.partial(_mm_res_kernel_k1, relu=relu)
        return pl.pallas_call(
            kernel,
            out_shape=jax.ShapeDtypeStruct((M, Nout), out_dtype),
            grid=(gm, gn),
            in_specs=in_specs,
            out_specs=pl.BlockSpec((TM, TN), lambda i, j: (i, j)),
            compiler_params=pltpu.CompilerParams(
                dimension_semantics=("parallel", "parallel"),
                vmem_limit_bytes=_VMEM_LIMIT),
            cost_estimate=pl.CostEstimate(flops=flops, transcendentals=0,
                                          bytes_accessed=int(bytes_accessed)),
        )(*args)

    # K-tiled path with a resident f32 accumulator.
    in_specs = [
        pl.BlockSpec((TM, TK), lambda i, j, k: (i, k)),
        pl.BlockSpec((TK, TN), lambda i, j, k: (k, j)),
        pl.BlockSpec((1, TN), lambda i, j, k: (0, j)),
    ]
    args = [x2d, w, b2]
    if residual is None:
        kernel = functools.partial(_mm_kernel, relu=relu)
    else:
        in_specs.append(pl.BlockSpec((TM, TN), lambda i, j, k: (i, j)))
        args.append(residual)
        kernel = functools.partial(_mm_res_kernel, relu=relu)

    return pl.pallas_call(
        kernel,
        out_shape=jax.ShapeDtypeStruct((M, Nout), out_dtype),
        grid=(gm, gn, gk),
        in_specs=in_specs,
        out_specs=pl.BlockSpec((TM, TN), lambda i, j, k: (i, j)),
        scratch_shapes=[pltpu.VMEM((TM, TN), jnp.float32)],
        compiler_params=pltpu.CompilerParams(
            dimension_semantics=("parallel", "parallel", "arbitrary"),
            vmem_limit_bytes=_VMEM_LIMIT),
        cost_estimate=pl.CostEstimate(flops=flops, transcendentals=0,
                                      bytes_accessed=int(bytes_accessed)),
    )(*args)


# ----------------------------------------------------------------------------
# fused 3x3 conv + bias + ReLU kernel (tap accumulation, no 9x im2col in HBM)
# ----------------------------------------------------------------------------
def _conv3x3_kernel(x_ref, w_ref, b_ref, o_ref, acc_ref, *, taps, relu):
    m = acc_ref.shape[0]
    for t, (p, shift) in enumerate(taps):
        contrib = jnp.dot(x_ref[0, p, shift:shift + m, :], w_ref[t],
                          preferred_element_type=jnp.float32)
        if t == 0:
            acc_ref[...] = contrib
        else:
            acc_ref[...] += contrib
    out = acc_ref[...] + b_ref[...]
    if relu:
        out = jnp.maximum(out, 0.0)
    o_ref[0] = out.astype(o_ref.dtype)


def im2col_3x3(x_nhwc, stride):
    """Host-side im2col (used only for the tiny 3-channel stem / fallback)."""
    N, H, W, C = x_nhwc.shape
    xp = jnp.pad(x_nhwc, ((0, 0), (1, 1), (1, 1), (0, 0)))
    Ho = (H - 1) // stride + 1
    Wo = (W - 1) // stride + 1
    cols = []
    for kh in range(3):
        for kw in range(3):
            cols.append(xp[:, kh:kh + stride * (Ho - 1) + 1:stride,
                           kw:kw + stride * (Wo - 1) + 1:stride, :])
    return jnp.concatenate(cols, axis=-1)            # (N, Ho, Wo, 9*C)


def conv3x3_bn_act(x_nhwc, w_hwio, bias, stride=1, relu=True,
                   out_dtype=jnp.bfloat16):
    """3x3 conv (pad=1) + folded-BN bias + ReLU with the 9 taps fused in-kernel."""
    N, H, W, C = x_nhwc.shape
    assert w_hwio.shape[:3] == (3, 3, C)
    Cout = w_hwio.shape[3]
    s = stride
    Ho = (H - 1) // s + 1
    Wo = (W - 1) // s + 1

    x_nhwc = x_nhwc.astype(jnp.bfloat16)
    w_hwio = w_hwio.astype(jnp.bfloat16)

    Hp, Wp = H + 2, W + 2
    Hh, Wh = -(-Hp // s), -(-Wp // s)            # parity-plane extents
    Mout = Ho * Wh                               # output rows on the (Ho, Wh) grid
    max_shift = (2 // s) * Wh + (2 // s)
    R = Hh * Wh
    Rpad = max(R, Mout + max_shift)
    TN = Cout if Cout <= 256 else 256

    slab = 2 * (s * s * Rpad * C + 9 * C * Cout + Mout * Cout) + 4 * Mout * TN
    if slab > 40 * 1024 * 1024:
        # TODO(synk): spatially-tiled fused conv for very large images; fall
        # back to host im2col + the matmul kernel in that regime.
        patches = im2col_3x3(x_nhwc, s)
        K = patches.shape[-1]
        out = matmul_bias_act(patches.reshape(-1, K), w_hwio.reshape(K, Cout),
                              bias, relu=relu, out_dtype=out_dtype)
        return out.reshape(N, Ho, Wo, Cout)

    # pad by 1, then space-to-depth so every (kh, kw) tap becomes a contiguous
    # row window of a flattened parity plane (works for stride 1 and 2).
    xpad = jnp.pad(x_nhwc, ((0, 0), (1, 1), (1, 1), (0, 0)))
    if s > 1:
        xpad = jnp.pad(xpad, ((0, 0), (0, Hh * s - Hp), (0, Wh * s - Wp), (0, 0)))
        xp = xpad.reshape(N, Hh, s, Wh, s, C).transpose(0, 2, 4, 1, 3, 5)
        xp = xp.reshape(N, s * s, Hh * Wh, C)
    else:
        xp = xpad.reshape(N, 1, Hp * Wp, C)
    if Rpad > R:
        xp = jnp.pad(xp, ((0, 0), (0, 0), (0, Rpad - R), (0, 0)))

    taps = tuple(((kh % s) * s + (kw % s), (kh // s) * Wh + (kw // s))
                 for kh in range(3) for kw in range(3))
    w9 = w_hwio.reshape(9, C, Cout)
    b2 = bias.reshape(1, Cout).astype(jnp.float32)
    gn = pl.cdiv(Cout, TN)

    kernel = functools.partial(_conv3x3_kernel, taps=taps, relu=relu)
    out = pl.pallas_call(
        kernel,
        out_shape=jax.ShapeDtypeStruct((N, Mout, Cout), out_dtype),
        grid=(N, gn),
        in_specs=[
            pl.BlockSpec((1, s * s, Rpad, C), lambda n, j: (n, 0, 0, 0)),
            pl.BlockSpec((9, C, TN), lambda n, j: (0, 0, j)),
            pl.BlockSpec((1, TN), lambda n, j: (0, j)),
        ],
        out_specs=pl.BlockSpec((1, Mout, TN), lambda n, j: (n, 0, j)),
        scratch_shapes=[pltpu.VMEM((Mout, TN), jnp.float32)],
        compiler_params=pltpu.CompilerParams(
            dimension_semantics=("parallel", "parallel"),
            vmem_limit_bytes=_VMEM_LIMIT),
        cost_estimate=pl.CostEstimate(
            flops=2 * 9 * N * Mout * C * Cout,
            transcendentals=0,
            bytes_accessed=int(2 * (xp.size + N * w9.size + N * Mout * Cout))),
    )(xp, w9, b2)

    # drop the Wh-grid's garbage columns (ow >= Wo); XLA fuses this slice.
    return out.reshape(N, Ho, Wh, Cout)[:, :, :Wo, :]


# ----------------------------------------------------------------------------
# Bottleneck block / full ResNet forward (Pallas path)
# ----------------------------------------------------------------------------
def bottleneck_forward(x_nhwc, p, stride=1):
    N, H, W, Cin = x_nhwc.shape
    planes = p["w1"].shape[1]
    Cout = p["w3"].shape[1]

    x2d = x_nhwc.reshape(N * H * W, Cin)

    out1 = matmul_bias_act(x2d, p["w1"], p["b1"], relu=True)
    out1 = out1.reshape(N, H, W, planes)

    out2 = conv3x3_bn_act(out1, p["w2"], p["b2"], stride=stride, relu=True)
    _, Ho, Wo, _ = out2.shape

    if "w_sc" in p:
        xs = x_nhwc[:, ::stride, ::stride, :]
        sc = matmul_bias_act(xs.reshape(N * Ho * Wo, Cin), p["w_sc"],
                             p["b_sc"], relu=False)
    else:
        sc = x2d                                      # identity shortcut

    out3 = matmul_bias_act(out2.reshape(N * Ho * Wo, planes), p["w3"],
                           p["b3"], residual=sc, relu=True)
    return out3.reshape(N, Ho, Wo, Cout)


def resnet_forward(x_nchw, params):
    x = jnp.transpose(x_nchw, (0, 2, 3, 1)).astype(jnp.bfloat16)   # NHWC
    # stem: 3x3, stride 1, pad 1, 3 -> 64 (K = 27, host im2col is negligible)
    st = params["stem"]
    patches = im2col_3x3(x, stride=1)
    N, H, W, K = patches.shape
    out = matmul_bias_act(patches.reshape(-1, K), st["w"], st["b"], relu=True)
    out = out.reshape(N, H, W, -1)

    for layer in params["layers"]:
        for blk in layer:
            out = bottleneck_forward(out, blk["p"], blk["stride"])

    # F.avg_pool2d(out, 4) + flatten (4x4 feature map -> global average).
    N, Ho, Wo, C = out.shape
    assert Ho % 4 == 0 and Wo % 4 == 0
    pooled = out.astype(jnp.float32).reshape(
        N, Ho // 4, 4, Wo // 4, 4, C).mean(axis=(2, 4))
    feat = pooled.reshape(N, -1)
    return matmul_bias_act(feat, params["fc_w"], params["fc_b"], relu=False,
                           out_dtype=jnp.float32)


# ----------------------------------------------------------------------------
# parameters (deterministic, synthetic; BN folded into weights/bias, bf16)
# ----------------------------------------------------------------------------
def _fold_bn(w, gamma, beta, mean, var, eps=1e-5):
    scale = gamma / jnp.sqrt(var + eps)
    return w * scale, beta - mean * scale


def _make_convbn(key, k, cin, cout):
    kw_, kg, kb, km, kv = jax.random.split(key, 5)
    w = jax.random.normal(kw_, (k, k, cin, cout), jnp.float32) * jnp.sqrt(
        2.0 / (k * k * cin))
    gamma = 1.0 + 0.1 * jax.random.normal(kg, (cout,), jnp.float32)
    beta = 0.1 * jax.random.normal(kb, (cout,), jnp.float32)
    mean = 0.1 * jax.random.normal(km, (cout,), jnp.float32)
    var = jnp.abs(jax.random.normal(kv, (cout,), jnp.float32)) + 0.5
    wf, bf = _fold_bn(w, gamma, beta, mean, var)
    return wf.astype(jnp.bfloat16), bf.astype(jnp.float32)


def make_bottleneck_params(key, in_planes, planes, stride, expansion=4):
    k1, k2, k3, k4 = jax.random.split(key, 4)
    p = {}
    w1, p["b1"] = _make_convbn(k1, 1, in_planes, planes)
    p["w1"] = w1.reshape(in_planes, planes)
    p["w2"], p["b2"] = _make_convbn(k2, 3, planes, planes)          # HWIO
    w3, p["b3"] = _make_convbn(k3, 1, planes, expansion * planes)
    p["w3"] = w3.reshape(planes, expansion * planes)
    if stride != 1 or in_planes != expansion * planes:
        wsc, p["b_sc"] = _make_convbn(k4, 1, in_planes, expansion * planes)
        p["w_sc"] = wsc.reshape(in_planes, expansion * planes)
    return p


def make_resnet_params(key, num_blocks, num_classes=10, expansion=4):
    k_stem, k_layers, k_fc = jax.random.split(key, 3)
    params = {}
    ws, bs = _make_convbn(k_stem, 3, 3, 64)
    params["stem"] = {"w_hwio": ws, "w": ws.reshape(27, 64), "b": bs}

    in_planes = 64
    layers = []
    block_keys = jax.random.split(k_layers, sum(num_blocks))
    idx = 0
    for planes, s0, nb in zip([64, 128, 256, 512], [1, 2, 2, 2], num_blocks):
        blocks = []
        for st in [s0] + [1] * (nb - 1):
            bp = make_bottleneck_params(block_keys[idx], in_planes, planes,
                                        st, expansion)
            blocks.append({"p": bp, "stride": st})
            in_planes = planes * expansion
            idx += 1
        layers.append(blocks)
    params["layers"] = layers

    kw_, kb = jax.random.split(k_fc)
    d = 512 * expansion
    params["fc_w"] = (jax.random.normal(kw_, (d, num_classes), jnp.float32)
                      / jnp.sqrt(float(d))).astype(jnp.bfloat16)
    params["fc_b"] = 0.01 * jax.random.normal(kb, (num_classes,), jnp.float32)
    return params


# ----------------------------------------------------------------------------
# pure-JAX reference (lax.conv) mirroring the same bf16 rounding points
# ----------------------------------------------------------------------------
def _bf(a):
    return a.astype(jnp.bfloat16)


def _conv_ref(x, w_hwio, stride, padding):
    dn = lax.conv_dimension_numbers(x.shape, w_hwio.shape,
                                    ("NHWC", "HWIO", "NHWC"))
    return lax.conv_general_dilated(
        _bf(x), _bf(w_hwio), (stride, stride), padding,
        dimension_numbers=dn, preferred_element_type=jnp.float32)


def bottleneck_reference(x, p, stride=1):
    Cin = x.shape[-1]
    planes = p["w1"].shape[1]
    Cout = p["w3"].shape[1]
    o = _conv_ref(x, p["w1"].reshape(1, 1, Cin, planes), 1, "VALID")
    o = _bf(jnp.maximum(o + p["b1"], 0.0))
    o = _conv_ref(o, p["w2"], stride, ((1, 1), (1, 1)))
    o = _bf(jnp.maximum(o + p["b2"], 0.0))
    o = _conv_ref(o, p["w3"].reshape(1, 1, planes, Cout), 1, "VALID")
    o = o + p["b3"]
    if "w_sc" in p:
        s = _conv_ref(x, p["w_sc"].reshape(1, 1, Cin, Cout), stride, "VALID")
        s = _bf(s + p["b_sc"])
    else:
        s = _bf(x[:, ::stride, ::stride, :])
    return _bf(jnp.maximum(o + s.astype(jnp.float32), 0.0))


def resnet_reference(x_nchw, params):
    x = jnp.transpose(x_nchw, (0, 2, 3, 1))
    o = _conv_ref(x, params["stem"]["w_hwio"], 1, ((1, 1), (1, 1)))
    o = _bf(jnp.maximum(o + params["stem"]["b"], 0.0))
    for layer in params["layers"]:
        for blk in layer:
            o = bottleneck_reference(o, blk["p"], blk["stride"])
    N, Ho, Wo, C = o.shape
    pooled = o.astype(jnp.float32).reshape(
        N, Ho // 4, 4, Wo // 4, 4, C).mean(axis=(2, 4))
    feat = pooled.reshape(N, -1)
    return (jnp.dot(_bf(feat), _bf(params["fc_w"]),
                    preferred_element_type=jnp.float32) + params["fc_b"])


if __name__ == "__main__":
    key = jax.random.PRNGKey(0)
    kx, kp = jax.random.split(key)

    num_blocks = [1, 1, 1, 1]           # one Bottleneck per stage (small test)
    N, H, W = 2, 32, 32                 # 32x32 input -> 4x4 map before avg_pool(4)
    x = jax.random.normal(kx, (N, 3, H, W), jnp.float32)
    params = make_resnet_params(kp, num_blocks, num_classes=10)

    logits = jax.block_until_ready(resnet_forward(x, params))
    assert logits.shape == (N, 10), logits.shape

    ref = jax.block_until_ready(resnet_reference(x, params))
    max_err = float(jnp.max(jnp.abs(logits - ref)))
    assert jnp.allclose(logits, ref, atol=3e-2, rtol=3e-2), max_err

    print("KERNEL_OK")
</pallas_src>

<mosaic_0001>
module attributes {stable_mosaic.version = 11 : i64} {
  func.func @_mm_kernel_k1(%arg0: i32, %arg1: i32, %arg2: memref<512x27xbf16, #tpu.memory_space<vmem>>, %arg3: memref<27x64xbf16, #tpu.memory_space<vmem>>, %arg4: memref<1x64xf32, #tpu.memory_space<vmem>>, %arg5: memref<512x64xbf16, #tpu.memory_space<vmem>>) attributes {dimension_semantics = [#tpu.dimension_semantics<parallel>, #tpu.dimension_semantics<parallel>], iteration_bounds = array<i64: 4, 1>, scalar_prefetch = 0 : i64, scratch_operands = 0 : i64, tpu.core_type = #tpu.core_type<tc>, window_params = [{transform_indices = @transform_0, window_bounds = array<i64: 512, 27>}, {transform_indices = @transform_1, window_bounds = array<i64: 27, 64>}, {transform_indices = @transform_2, window_bounds = array<i64: 1, 64>}, {transform_indices = @transform_3, window_bounds = array<i64: 512, 64>}]} {
    %c0 = arith.constant 0 : index
    %c0_0 = arith.constant 0 : index
    %0 = vector.load %arg2[%c0, %c0_0] : memref<512x27xbf16, #tpu.memory_space<vmem>>, vector<512x27xbf16>
    %c0_1 = arith.constant 0 : index
    %c0_2 = arith.constant 0 : index
    %1 = vector.load %arg3[%c0_1, %c0_2] : memref<27x64xbf16, #tpu.memory_space<vmem>>, vector<27x64xbf16>
    %cst = arith.constant dense<0.000000e+00> : vector<512x64xf32>
    %2 = tpu.matmul %0, %1, %cst {dimension_numbers = #tpu.dot_dimension_numbers<[1], [0], [0], [1], [0, 0, 1, 1], [], []>} : vector<512x27xbf16>, vector<27x64xbf16>, vector<512x64xf32> -> vector<512x64xf32>
    %c0_3 = arith.constant 0 : index
    %c0_4 = arith.constant 0 : index
    %3 = vector.load %arg4[%c0_3, %c0_4] : memref<1x64xf32, #tpu.memory_space<vmem>>, vector<1x64xf32>
    %4 = vector.broadcast %3 : vector<1x64xf32> to vector<512x64xf32>
    %5 = arith.addf %2, %4 : vector<512x64xf32>
    %cst_5 = arith.constant 0.000000e+00 : f32
    %6 = vector.broadcast %cst_5 : f32 to vector<512x64xf32>
    %7 = arith.maximumf %5, %6 : vector<512x64xf32>
    %8 = arith.truncf %7 : vector<512x64xf32> to vector<512x64xbf16>
    %c0_6 = arith.constant 0 : index
    %c0_7 = arith.constant 0 : index
    %9 = vector.load %arg5[%c0_6, %c0_7] : memref<512x64xbf16, #tpu.memory_space<vmem>>, vector<512x64xbf16>
    tpu.vector_store %arg5[%c0_6, %c0_7], %8 {strides = array<i32>} : memref<512x64xbf16, #tpu.memory_space<vmem>>, vector<512x64xbf16>,
    return
  }
  func.func @transform_0(%arg0: i32, %arg1: i32) -> (i32, i32) {
    %c0_i32 = arith.constant 0 : i32
    %c0_i32_0 = arith.constant 0 : i32
    return %arg0, %c0_i32 : i32, i32
  }
  func.func @transform_1(%arg0: i32, %arg1: i32) -> (i32, i32) {
    %c0_i32 = arith.constant 0 : i32
    %c0_i32_0 = arith.constant 0 : i32
    return %c0_i32, %arg1 : i32, i32
  }
  func.func @transform_2(%arg0: i32, %arg1: i32) -> (i32, i32) {
    %c0_i32 = arith.constant 0 : i32
    %c0_i32_0 = arith.constant 0 : i32
    return %c0_i32, %arg1 : i32, i32
  }
  func.func @transform_3(%arg0: i32, %arg1: i32) -> (i32, i32) {
    %c0_i32 = arith.constant 0 : i32
    return %arg0, %arg1 : i32, i32
  }
}

</mosaic_0001>

<bundles_post_ra>
// kernel: tpu_custom_call.1
= control target key start
LH: loop header
LB: loop body
LE: loop exit
PB: predicated region body
PF: predicated region fallthrough
CT: control target
= control target key end

     0   :  { %s1770_s12 = smov 0   ;;  %s1772_s13 = smov 0   ;;  %s2081_s0 = inlined_call_operand.vmem [shape: bf16[2048,27], index: 0, kind: input, shape index: {}]   ;;  %s2082_s1 = inlined_call_operand.vmem [shape: bf16[27,64], index: 1, kind: input, shape index: {}]   ;;  %s2083_s2 = inlined_call_operand.vmem [shape: f32[1,64], index: 2, kind: input, shape index: {}]   ;;  %s2084_s3 = inlined_call_operand.vmem [shape: bf16[2048,64], index: 3, kind: output, shape index: {}]  }
   0x1   :  { %s1774_s14 = smov 0  }
   0x2 LB: > { %s25_s15 = sadd.s32 1, %s1743_s13  ;;  %p1358_p0 = scmp.ge.s32.totalorder %s1747_s14, 1  ;;  %s1747_s14 = sphi %s1774_s14, %s13_s14   ;;  %s1743_s13 = sphi %s1772_s13, %s2086_s13   ;;  %s1739_s12 = sphi %s1770_s12, %s2085_s12  }
   0x3   : > { %p27_p1 = scmp.ge.s32.totalorder %s25_s15, 4  ;;  %p169_p2 = scmp.lt.s32.totalorder %s1747_s14, 5 }
   0x5   : > { %s2088_s15 = smov (%p27_p1, %s25_s15), 0  ;;  %p170_p3 = pnand %p1358_p0, %p169_p2 }
   0x6   : > { %s1359_s18 = sshll.u32 (!%p170_p3), %s1739_s12, 6 }
   0x7   : > { %173 = sbr.rel (%p170_p3) target bundleno = 287 (0x11f), region = 32  ;;  %p204_p4 = scmp.lt.s32.totalorder (!%p170_p3), %s1359_s18, 255 }
   0xc   : > { %v1691_v0 = vld [vmem:[%s2082_s1 + $0x8] sm:$0x3f]   ;;  %vm569_vm0 = vcmask 1044480   ;;  %vm570_vm1 = vcmask 1045504   ;;  %v1749_v1 = vmov 65535   ;;  %v1692_v5 = vld [vmem:[%s2082_s1] sm:$0xff]  }
   0xd   : > { %v571_v2 = vsel %vm569_vm0, 4294967295, %v1749_v1  ;;  %s2090_s18 = smov (!%p204_p4, %s1359_s18), 255  ;;  %vm472_vm2 = vcmask 220160   ;;  %v1871_v38 = vld [vmem:[%s2083_s2] ss:$0 sm:$0xff]  ;;  %vm1185_vm3 = vcmask 519168  }
   0xe   : > { %v572_v3 = vsel %vm570_vm1, %v571_v2, 0  ;;  %s1360_s21 = sshll.u32 %s2090_s18, 2 }
   0xf   : > { %v574_v4 = vand.u32 %v1691_v0, %v572_v3  ;;  %s1802_s24 = scalar_lea.vmem %s2081_s0, %s1360_s21  ;;  %s1882_s29 = scalar_lea.vmem %s2084_s3, %s1360_s21 }
  0x10   : > { %v1693_v6 = vld [vmem:[%s1802_s24] sm:$0xff]   ;;  %v1695_v8 = vld [vmem:[%s1802_s24 + $0x8] sm:$0xff]   ;;  %v1697_v10 = vld [vmem:[%s1802_s24 + $0x10] sm:$0xff]  }
  0x11   : > { %1594 = vmatprep.subr.bf16.mxu0 %v574_v4  ;;  %1662 = vmatprep.subr.bf16.mxu1 %v574_v4  ;;  %v1694_v7 = vld [vmem:[%s1802_s24 + $0x80] sm:$0xff]   ;;  %v1696_v9 = vld [vmem:[%s1802_s24 + $0x88] sm:$0xff]   ;;  %v1698_v11 = vld [vmem:[%s1802_s24 + $0x90] sm:$0xff]  }
  0x12   : > { %1595 = vmatpush3.bf16.msra.mxu0 %v574_v4  ;;  %1664 = vmatpush3.bf16.msra.mxu1 %v574_v4  ;;  %v1699_v12 = vld [vmem:[%s1802_s24 + $0x18] sm:$0xff]   ;;  %v1701_v14 = vld [vmem:[%s1802_s24 + $0x20] sm:$0xff]   ;;  %v1703_v16 = vld [vmem:[%s1802_s24 + $0x28] sm:$0xff]  }
  0x13   : > { %1596 = vmatprep.subr.bf16.mxu0 %v1692_v5  ;;  %1663 = vmatprep.subr.bf16.mxu1 %v1692_v5  ;;  %v1700_v13 = vld [vmem:[%s1802_s24 + $0x98] sm:$0xff]   ;;  %v1702_v15 = vld [vmem:[%s1802_s24 + $0xa0] sm:$0xff]   ;;  %v1704_v17 = vld [vmem:[%s1802_s24 + $0xa8] sm:$0xff]  }
  0x14   : > { %1598 = vmatprep.mubr.msk.bf16.mxu0 %vm472_vm2, %v1693_v6  ;;  %1630 = vmatprep.mubr.msk.bf16.mxu1 %vm472_vm2, %v1694_v7  ;;  %v1705_v18 = vld [vmem:[%s1802_s24 + $0x30] sm:$0xff]   ;;  %v1707_v20 = vld [vmem:[%s1802_s24 + $0x38] sm:$0xff]   ;;  %v1709_v22 = vld [vmem:[%s1802_s24 + $0x40] sm:$0xff]  }
  0x15   : > { %v1706_v19 = vld [vmem:[%s1802_s24 + $0xb0] sm:$0xff]   ;;  %v1708_v21 = vld [vmem:[%s1802_s24 + $0xb8] sm:$0xff]   ;;  %v1710_v23 = vld [vmem:[%s1802_s24 + $0xc0] sm:$0xff]  }
  0x16   : > { %1597 = vmatpush3.bf16.msra.mxu0 %v1692_v5  ;;  %1665 = vmatpush3.bf16.msra.mxu1 %v1692_v5  ;;  %v1711_v24 = vld [vmem:[%s1802_s24 + $0x48] sm:$0xff]   ;;  %v1713_v26 = vld [vmem:[%s1802_s24 + $0x50] sm:$0xff]   ;;  %v1715_v28 = vld [vmem:[%s1802_s24 + $0x58] sm:$0xff]  }
  0x17   : > { %v1712_v25 = vld [vmem:[%s1802_s24 + $0xc8] sm:$0xff]   ;;  %v1714_v27 = vld [vmem:[%s1802_s24 + $0xd0] sm:$0xff]   ;;  %v1716_v29 = vld [vmem:[%s1802_s24 + $0xd8] sm:$0xff]  }
  0x18   : > { %v1717_v30 = vld [vmem:[%s1802_s24 + $0x60] sm:$0xff]   ;;  %v1719_v32 = vld [vmem:[%s1802_s24 + $0x68] sm:$0xff]   ;;  %v1721_v34 = vld [vmem:[%s1802_s24 + $0x70] sm:$0xff]  }
  0x19   : > { %1599 = vmatmul.mubr.msk.bf16.vlgmr.msra.gmra.mxu0 %vm472_vm2, %v1695_v8  ;;  %1631 = vmatmul.mubr.msk.bf16.vlgmr.msra.gmra.mxu1 %vm472_vm2, %v1696_v9  ;;  %v1718_v31 = vld [vmem:[%s1802_s24 + $0xe0] sm:$0xff]   ;;  %v1720_v33 = vld [vmem:[%s1802_s24 + $0xe8] sm:$0xff]   ;;  %v1722_v35 = vld [vmem:[%s1802_s24 + $0xf0] sm:$0xff]  }
  0x1a   : > { %1602 = vmatprep.mubr.msk.bf16.mxu0 %vm472_vm2, %v1697_v10  ;;  %1634 = vmatprep.mubr.msk.bf16.mxu1 %vm472_vm2, %v1698_v11  ;;  %v1723_v36 = vld [vmem:[%s1802_s24 + $0x78] sm:$0xff]  }
  0x1b   : > { %v1724_v37 = vld [vmem:[%s1802_s24 + $0xf8] sm:$0xff]  }
  0x21   : > { %1603 = vmatmul.mubr.msk.bf16.gmra.mxu0 %vm472_vm2, %v1699_v12  ;;  %1635 = vmatmul.mubr.msk.bf16.gmra.mxu1 %vm472_vm2, %v1700_v13 }
  0x22   : > { %1606 = vmatprep.mubr.msk.bf16.mxu0 %vm472_vm2, %v1701_v14  ;;  %1638 = vmatprep.mubr.msk.bf16.mxu1 %vm472_vm2, %v1702_v15 }
  0x29   : > { %1607 = vmatmul.mubr.msk.bf16.gmra.mxu0 %vm472_vm2, %v1703_v16  ;;  %1639 = vmatmul.mubr.msk.bf16.gmra.mxu1 %vm472_vm2, %v1704_v17 }
  0x2a   : > { %1610 = vmatprep.mubr.msk.bf16.mxu0 %vm472_vm2, %v1705_v18  ;;  %1642 = vmatprep.mubr.msk.bf16.mxu1 %vm472_vm2, %v1706_v19 }
  0x31   : > { %1611 = vmatmul.mubr.msk.bf16.gmra.mxu0 %vm472_vm2, %v1707_v20  ;;  %1643 = vmatmul.mubr.msk.bf16.gmra.mxu1 %vm472_vm2, %v1708_v21 }
  0x32   : > { %1614 = vmatprep.mubr.msk.bf16.mxu0 %vm472_vm2, %v1709_v22  ;;  %1646 = vmatprep.mubr.msk.bf16.mxu1 %vm472_vm2, %v1710_v23 }
  0x39   : > { %1615 = vmatmul.mubr.msk.bf16.gmra.mxu0 %vm472_vm2, %v1711_v24  ;;  %1647 = vmatmul.mubr.msk.bf16.gmra.mxu1 %vm472_vm2, %v1712_v25 }
  0x3a   : > { %1618 = vmatprep.mubr.msk.bf16.mxu0 %vm472_vm2, %v1713_v26  ;;  %1650 = vmatprep.mubr.msk.bf16.mxu1 %vm472_vm2, %v1714_v27 }
  0x41   : > { %1619 = vmatmul.mubr.msk.bf16.gmra.mxu0 %vm472_vm2, %v1715_v28  ;;  %1651 = vmatmul.mubr.msk.bf16.gmra.mxu1 %vm472_vm2, %v1716_v29 }
  0x42   : > { %1622 = vmatprep.mubr.msk.bf16.mxu0 %vm472_vm2, %v1717_v30  ;;  %1654 = vmatprep.mubr.msk.bf16.mxu1 %vm472_vm2, %v1718_v31 }
  0x49   : > { %1623 = vmatmul.mubr.msk.bf16.gmra.mxu0 %vm472_vm2, %v1719_v32  ;;  %1655 = vmatmul.mubr.msk.bf16.gmra.mxu1 %vm472_vm2, %v1720_v33 }
  0x4a   : > { %1626 = vmatprep.mubr.msk.bf16.mxu0 %vm472_vm2, %v1721_v34  ;;  %1658 = vmatprep.mubr.msk.bf16.mxu1 %vm472_vm2, %v1722_v35 }
  0x51   : > { %1627 = vmatmul.mubr.msk.bf16.gmra.mxu0 %vm472_vm2, %v1723_v36  ;;  %1659 = vmatmul.mubr.msk.bf16.gmra.mxu1 %vm472_vm2, %v1724_v37 }
  0xd9   : > { %v1600_v39 = vpop.f32.mrf.mxu0  ;;  %v1632_v40 = vpop.f32.mrf.mxu1 }
  0xda   : > { %v619_v41 = vadd.f32 %v1600_v39, %v1871_v38  ;;  %v747_v42 = vadd.f32 %v1632_v40, %v1871_v38 }
  0xdb   : > { %v610_v43 = vpop.f32.mrf.mxu0  ;;  %v738_v44 = vpop.f32.mrf.mxu1 }
  0xdc   : > { %v867_v45 = vmax.f32 %v619_v41, 0.0  ;;  %v899_v46 = vmax.f32 %v747_v42, 0.0  ;;  %v611_v47 = vadd.f32 %v1871_v38, %v610_v43  ;;  %v739_v48 = vadd.f32 %v1871_v38, %v738_v44 }
  0xdd   : > { %v1601_v49 = vpop.f32.mrf.mxu0  ;;  %v1633_v50 = vpop.f32.mrf.mxu1 }
  0xde   : > { %v1498_v51 = vpack.c.bf16 %v867_v45, %v867_v45  ;;  %v1530_v52 = vpack.c.bf16 %v899_v46, %v899_v46  ;;  %v865_v53 = vmax.f32 %v611_v47, 0.0  ;;  %v897_v54 = vmax.f32 %v739_v48, 0.0 }
  0xdf   : > { %v622_v55 = vadd.f32 %v1601_v49, %v1871_v38  ;;  %v750_v56 = vadd.f32 %v1633_v50, %v1871_v38  ;;  %v613_v57 = vpop.f32.mrf.mxu0  ;;  %v741_v58 = vpop.f32.mrf.mxu1 }
  0xe0   : > { %1188 = vst.msk [vmem:[%s1882_s29 + $0x8] sm:$0xf] %vm1185_vm3, %v1498_v51  ;;  %1220 = vst.msk [vmem:[%s1882_s29 + $0x88] sm:$0xf] %vm1185_vm3, %v1530_v52  ;;  %v1496_v59 = vpack.c.bf16 %v865_v53, %v865_v53  ;;  %v1528_v60 = vpack.c.bf16 %v897_v54, %v897_v54  ;;  %v614_v61 = vadd.f32 %v1871_v38, %v613_v57 }
  0xe1   : > { %v742_v62 = vadd.f32 %v1871_v38, %v741_v58  ;;  %v868_v63 = vmax.f32 %v622_v55, 0.0  ;;  %v900_v0 = vmax.f32 %v750_v56, 0.0  ;;  %v1604_v1 = vpop.f32.mrf.mxu0  ;;  %v1636_v2 = vpop.f32.mrf.mxu1 }
  0xe2   : > { %1186 = vst.msk [vmem:[%s1882_s29] sm:$0xf] %vm1185_vm3, %v1496_v59  ;;  %1218 = vst.msk [vmem:[%s1882_s29 + $0x80] sm:$0xf] %vm1185_vm3, %v1528_v60  ;;  %v866_v3 = vmax.f32 %v614_v61, 0.0  ;;  %v635_v5 = vadd.f32 %v1604_v1, %v1871_v38  ;;  %v763_v6 = vadd.f32 %v1636_v2, %v1871_v38 }
  0xe3   : > { %v898_v4 = vmax.f32 %v742_v62, 0.0  ;;  %v1499_v7 = vpack.c.bf16 %v868_v63, %v868_v63  ;;  %v1531_v8 = vpack.c.bf16 %v900_v0, %v900_v0  ;;  %v626_v9 = vpop.f32.mrf.mxu0  ;;  %v754_v10 = vpop.f32.mrf.mxu1 }
  0xe4   : > { %v1497_v11 = vpack.c.bf16 %v866_v3, %v866_v3  ;;  %v871_v13 = vmax.f32 %v635_v5, 0.0  ;;  %v903_v14 = vmax.f32 %v763_v6, 0.0  ;;  %v627_v15 = vadd.f32 %v1871_v38, %v626_v9 }
  0xe5   : > { %v1529_v12 = vpack.c.bf16 %v898_v4, %v898_v4  ;;  %1189 = vst.msk [vmem:[%s1882_s29 + $0xc] sm:$0xf] %vm1185_vm3, %v1499_v7  ;;  %1221 = vst.msk [vmem:[%s1882_s29 + $0x8c] sm:$0xf] %vm1185_vm3, %v1531_v8  ;;  %v755_v16 = vadd.f32 %v1871_v38, %v754_v10  ;;  %v1605_v17 = vpop.f32.mrf.mxu0  ;;  %v1637_v18 = vpop.f32.mrf.mxu1 }
  0xe6   : > { %1187 = vst.msk [vmem:[%s1882_s29 + $0x4] sm:$0xf] %vm1185_vm3, %v1497_v11  ;;  %v1502_v19 = vpack.c.bf16 %v871_v13, %v871_v13  ;;  %v1534_v20 = vpack.c.bf16 %v903_v14, %v903_v14  ;;  %v638_v21 = vadd.f32 %v1605_v17, %v1871_v38  ;;  %v766_v22 = vadd.f32 %v1637_v18, %v1871_v38 }
  0xe7   : > { %1219 = vst.msk [vmem:[%s1882_s29 + $0x84] sm:$0xf] %vm1185_vm3, %v1529_v12  ;;  %v869_v23 = vmax.f32 %v627_v15, 0.0  ;;  %v901_v24 = vmax.f32 %v755_v16, 0.0  ;;  %v629_v25 = vpop.f32.mrf.mxu0  ;;  %v757_v26 = vpop.f32.mrf.mxu1 }
  0xe8   : > { %1192 = vst.msk [vmem:[%s1882_s29 + $0x18] sm:$0xf] %vm1185_vm3, %v1502_v19  ;;  %1224 = vst.msk [vmem:[%s1882_s29 + $0x98] sm:$0xf] %vm1185_vm3, %v1534_v20  ;;  %v872_v27 = vmax.f32 %v638_v21, 0.0  ;;  %v904_v28 = vmax.f32 %v766_v22, 0.0  ;;  %v630_v29 = vadd.f32 %v1871_v38, %v629_v25  ;;  %v758_v30 = vadd.f32 %v1871_v38, %v757_v26 }
  0xe9   : > { %v1500_v31 = vpack.c.bf16 %v869_v23, %v869_v23  ;;  %v1532_v32 = vpack.c.bf16 %v901_v24, %v901_v24  ;;  %v1608_v33 = vpop.f32.mrf.mxu0  ;;  %v1640_v34 = vpop.f32.mrf.mxu1 }
  0xea   : > { %v1503_v35 = vpack.c.bf16 %v872_v27, %v872_v27  ;;  %v1535_v36 = vpack.c.bf16 %v904_v28, %v904_v28  ;;  %v870_v37 = vmax.f32 %v630_v29, 0.0  ;;  %v902_v39 = vmax.f32 %v758_v30, 0.0 }
  0xeb   : > { %1190 = vst.msk [vmem:[%s1882_s29 + $0x10] sm:$0xf] %vm1185_vm3, %v1500_v31  ;;  %1222 = vst.msk [vmem:[%s1882_s29 + $0x90] sm:$0xf] %vm1185_vm3, %v1532_v32  ;;  %v651_v40 = vadd.f32 %v1608_v33, %v1871_v38  ;;  %v779_v41 = vadd.f32 %v1640_v34, %v1871_v38  ;;  %v642_v42 = vpop.f32.mrf.mxu0  ;;  %v770_v43 = vpop.f32.mrf.mxu1 }
  0xec   : > { %1193 = vst.msk [vmem:[%s1882_s29 + $0x1c] sm:$0xf] %vm1185_vm3, %v1503_v35  ;;  %1225 = vst.msk [vmem:[%s1882_s29 + $0x9c] sm:$0xf] %vm1185_vm3, %v1535_v36  ;;  %v1501_v44 = vpack.c.bf16 %v870_v37, %v870_v37  ;;  %v1533_v45 = vpack.c.bf16 %v902_v39, %v902_v39  ;;  %v643_v46 = vadd.f32 %v1871_v38, %v642_v42 }
  0xed   : > { %v771_v47 = vadd.f32 %v1871_v38, %v770_v43  ;;  %v875_v48 = vmax.f32 %v651_v40, 0.0  ;;  %v907_v49 = vmax.f32 %v779_v41, 0.0  ;;  %v1609_v50 = vpop.f32.mrf.mxu0  ;;  %v1641_v51 = vpop.f32.mrf.mxu1 }
  0xee   : > { %1191 = vst.msk [vmem:[%s1882_s29 + $0x14] sm:$0xf] %vm1185_vm3, %v1501_v44  ;;  %1223 = vst.msk [vmem:[%s1882_s29 + $0x94] sm:$0xf] %vm1185_vm3, %v1533_v45  ;;  %v873_v52 = vmax.f32 %v643_v46, 0.0  ;;  %v654_v54 = vadd.f32 %v1609_v50, %v1871_v38  ;;  %v782_v55 = vadd.f32 %v1641_v51, %v1871_v38 }
  0xef   : > { %v905_v53 = vmax.f32 %v771_v47, 0.0  ;;  %v1506_v56 = vpack.c.bf16 %v875_v48, %v875_v48  ;;  %v1538_v57 = vpack.c.bf16 %v907_v49, %v907_v49  ;;  %v645_v58 = vpop.f32.mrf.mxu0  ;;  %v773_v59 = vpop.f32.mrf.mxu1 }
  0xf0   : > { %v1504_v60 = vpack.c.bf16 %v873_v52, %v873_v52  ;;  %v876_v62 = vmax.f32 %v654_v54, 0.0  ;;  %v908_v63 = vmax.f32 %v782_v55, 0.0  ;;  %v646_v0 = vadd.f32 %v1871_v38, %v645_v58 }
  0xf1   : > { %v1536_v61 = vpack.c.bf16 %v905_v53, %v905_v53  ;;  %1196 = vst.msk [vmem:[%s1882_s29 + $0x28] sm:$0xf] %vm1185_vm3, %v1506_v56  ;;  %1228 = vst.msk [vmem:[%s1882_s29 + $0xa8] sm:$0xf] %vm1185_vm3, %v1538_v57  ;;  %v774_v1 = vadd.f32 %v1871_v38, %v773_v59  ;;  %v1612_v2 = vpop.f32.mrf.mxu0  ;;  %v1644_v3 = vpop.f32.mrf.mxu1 }
  0xf2   : > { %1194 = vst.msk [vmem:[%s1882_s29 + $0x20] sm:$0xf] %vm1185_vm3, %v1504_v60  ;;  %v1507_v4 = vpack.c.bf16 %v876_v62, %v876_v62  ;;  %v1539_v5 = vpack.c.bf16 %v908_v63, %v908_v63  ;;  %v667_v6 = vadd.f32 %v1612_v2, %v1871_v38  ;;  %v795_v7 = vadd.f32 %v1644_v3, %v1871_v38 }
  0xf3   : > { %1226 = vst.msk [vmem:[%s1882_s29 + $0xa0] sm:$0xf] %vm1185_vm3, %v1536_v61  ;;  %v874_v8 = vmax.f32 %v646_v0, 0.0  ;;  %v906_v9 = vmax.f32 %v774_v1, 0.0  ;;  %v658_v10 = vpop.f32.mrf.mxu0  ;;  %v786_v11 = vpop.f32.mrf.mxu1 }
  0xf4   : > { %1197 = vst.msk [vmem:[%s1882_s29 + $0x2c] sm:$0xf] %vm1185_vm3, %v1507_v4  ;;  %1229 = vst.msk [vmem:[%s1882_s29 + $0xac] sm:$0xf] %vm1185_vm3, %v1539_v5  ;;  %v879_v12 = vmax.f32 %v667_v6, 0.0  ;;  %v911_v13 = vmax.f32 %v795_v7, 0.0  ;;  %v659_v14 = vadd.f32 %v1871_v38, %v658_v10  ;;  %v787_v15 = vadd.f32 %v1871_v38, %v786_v11 }
  0xf5   : > { %v1505_v16 = vpack.c.bf16 %v874_v8, %v874_v8  ;;  %v1537_v17 = vpack.c.bf16 %v906_v9, %v906_v9  ;;  %v1613_v18 = vpop.f32.mrf.mxu0  ;;  %v1645_v19 = vpop.f32.mrf.mxu1 }
  0xf6   : > { %v1510_v20 = vpack.c.bf16 %v879_v12, %v879_v12  ;;  %v1542_v21 = vpack.c.bf16 %v911_v13, %v911_v13  ;;  %v877_v22 = vmax.f32 %v659_v14, 0.0  ;;  %v909_v23 = vmax.f32 %v787_v15, 0.0 }
  0xf7   : > { %1195 = vst.msk [vmem:[%s1882_s29 + $0x24] sm:$0xf] %vm1185_vm3, %v1505_v16  ;;  %1227 = vst.msk [vmem:[%s1882_s29 + $0xa4] sm:$0xf] %vm1185_vm3, %v1537_v17  ;;  %v670_v24 = vadd.f32 %v1613_v18, %v1871_v38  ;;  %v798_v25 = vadd.f32 %v1645_v19, %v1871_v38  ;;  %v661_v26 = vpop.f32.mrf.mxu0  ;;  %v789_v27 = vpop.f32.mrf.mxu1 }
  0xf8   : > { %1200 = vst.msk [vmem:[%s1882_s29 + $0x38] sm:$0xf] %vm1185_vm3, %v1510_v20  ;;  %1232 = vst.msk [vmem:[%s1882_s29 + $0xb8] sm:$0xf] %vm1185_vm3, %v1542_v21  ;;  %v1508_v28 = vpack.c.bf16 %v877_v22, %v877_v22  ;;  %v1540_v29 = vpack.c.bf16 %v909_v23, %v909_v23  ;;  %v662_v30 = vadd.f32 %v1871_v38, %v661_v26 }
  0xf9   : > { %v790_v31 = vadd.f32 %v1871_v38, %v789_v27  ;;  %v880_v32 = vmax.f32 %v670_v24, 0.0  ;;  %v912_v33 = vmax.f32 %v798_v25, 0.0  ;;  %v1616_v34 = vpop.f32.mrf.mxu0  ;;  %v1648_v35 = vpop.f32.mrf.mxu1 }
  0xfa   : > { %1198 = vst.msk [vmem:[%s1882_s29 + $0x30] sm:$0xf] %vm1185_vm3, %v1508_v28  ;;  %1230 = vst.msk [vmem:[%s1882_s29 + $0xb0] sm:$0xf] %vm1185_vm3, %v1540_v29  ;;  %v878_v36 = vmax.f32 %v662_v30, 0.0  ;;  %v683_v39 = vadd.f32 %v1616_v34, %v1871_v38  ;;  %v811_v40 = vadd.f32 %v1648_v35, %v1871_v38 }
  0xfb   : > { %v910_v37 = vmax.f32 %v790_v31, 0.0  ;;  %v1511_v41 = vpack.c.bf16 %v880_v32, %v880_v32  ;;  %v1543_v42 = vpack.c.bf16 %v912_v33, %v912_v33  ;;  %v674_v43 = vpop.f32.mrf.mxu0  ;;  %v802_v44 = vpop.f32.mrf.mxu1 }
  0xfc   : > { %v1509_v45 = vpack.c.bf16 %v878_v36, %v878_v36  ;;  %v883_v47 = vmax.f32 %v683_v39, 0.0  ;;  %v915_v48 = vmax.f32 %v811_v40, 0.0  ;;  %v675_v49 = vadd.f32 %v1871_v38, %v674_v43 }
  0xfd   : > { %v1541_v46 = vpack.c.bf16 %v910_v37, %v910_v37  ;;  %1201 = vst.msk [vmem:[%s1882_s29 + $0x3c] sm:$0xf] %vm1185_vm3, %v1511_v41  ;;  %1233 = vst.msk [vmem:[%s1882_s29 + $0xbc] sm:$0xf] %vm1185_vm3, %v1543_v42  ;;  %v803_v50 = vadd.f32 %v1871_v38, %v802_v44  ;;  %v1617_v51 = vpop.f32.mrf.mxu0  ;;  %v1649_v52 = vpop.f32.mrf.mxu1 }
  0xfe   : > { %1199 = vst.msk [vmem:[%s1882_s29 + $0x34] sm:$0xf] %vm1185_vm3, %v1509_v45  ;;  %v1514_v53 = vpack.c.bf16 %v883_v47, %v883_v47  ;;  %v1546_v54 = vpack.c.bf16 %v915_v48, %v915_v48  ;;  %v686_v55 = vadd.f32 %v1617_v51, %v1871_v38  ;;  %v814_v56 = vadd.f32 %v1649_v52, %v1871_v38 }
  0xff   : > { %1231 = vst.msk [vmem:[%s1882_s29 + $0xb4] sm:$0xf] %vm1185_vm3, %v1541_v46  ;;  %v881_v57 = vmax.f32 %v675_v49, 0.0  ;;  %v913_v58 = vmax.f32 %v803_v50, 0.0  ;;  %v677_v59 = vpop.f32.mrf.mxu0  ;;  %v805_v60 = vpop.f32.mrf.mxu1 }
 0x100   : > { %1204 = vst.msk [vmem:[%s1882_s29 + $0x48] sm:$0xf] %vm1185_vm3, %v1514_v53  ;;  %1236 = vst.msk [vmem:[%s1882_s29 + $0xc8] sm:$0xf] %vm1185_vm3, %v1546_v54  ;;  %v884_v61 = vmax.f32 %v686_v55, 0.0  ;;  %v916_v62 = vmax.f32 %v814_v56, 0.0  ;;  %v678_v63 = vadd.f32 %v1871_v38, %v677_v59  ;;  %v806_v0 = vadd.f32 %v1871_v38, %v805_v60 }
 0x101   : > { %v1512_v1 = vpack.c.bf16 %v881_v57, %v881_v57  ;;  %v1544_v2 = vpack.c.bf16 %v913_v58, %v913_v58  ;;  %v1620_v3 = vpop.f32.mrf.mxu0  ;;  %v1652_v4 = vpop.f32.mrf.mxu1 }
 0x102   : > { %v1515_v5 = vpack.c.bf16 %v884_v61, %v884_v61  ;;  %v1547_v6 = vpack.c.bf16 %v916_v62, %v916_v62  ;;  %v882_v7 = vmax.f32 %v678_v63, 0.0  ;;  %v914_v8 = vmax.f32 %v806_v0, 0.0 }
 0x103   : > { %1202 = vst.msk [vmem:[%s1882_s29 + $0x40] sm:$0xf] %vm1185_vm3, %v1512_v1  ;;  %1234 = vst.msk [vmem:[%s1882_s29 + $0xc0] sm:$0xf] %vm1185_vm3, %v1544_v2  ;;  %v699_v9 = vadd.f32 %v1620_v3, %v1871_v38  ;;  %v827_v10 = vadd.f32 %v1652_v4, %v1871_v38  ;;  %v690_v11 = vpop.f32.mrf.mxu0  ;;  %v818_v12 = vpop.f32.mrf.mxu1 }
 0x104   : > { %1205 = vst.msk [vmem:[%s1882_s29 + $0x4c] sm:$0xf] %vm1185_vm3, %v1515_v5  ;;  %1237 = vst.msk [vmem:[%s1882_s29 + $0xcc] sm:$0xf] %vm1185_vm3, %v1547_v6  ;;  %v1513_v13 = vpack.c.bf16 %v882_v7, %v882_v7  ;;  %v1545_v14 = vpack.c.bf16 %v914_v8, %v914_v8  ;;  %v691_v15 = vadd.f32 %v1871_v38, %v690_v11 }
 0x105   : > { %v819_v16 = vadd.f32 %v1871_v38, %v818_v12  ;;  %v887_v17 = vmax.f32 %v699_v9, 0.0  ;;  %v919_v18 = vmax.f32 %v827_v10, 0.0  ;;  %v1621_v19 = vpop.f32.mrf.mxu0  ;;  %v1653_v20 = vpop.f32.mrf.mxu1 }
 0x106   : > { %1203 = vst.msk [vmem:[%s1882_s29 + $0x44] sm:$0xf] %vm1185_vm3, %v1513_v13  ;;  %1235 = vst.msk [vmem:[%s1882_s29 + $0xc4] sm:$0xf] %vm1185_vm3, %v1545_v14  ;;  %v885_v21 = vmax.f32 %v691_v15, 0.0  ;;  %v702_v23 = vadd.f32 %v1621_v19, %v1871_v38  ;;  %v830_v24 = vadd.f32 %v1653_v20, %v1871_v38 }
 0x107   : > { %v917_v22 = vmax.f32 %v819_v16, 0.0  ;;  %v1518_v25 = vpack.c.bf16 %v887_v17, %v887_v17  ;;  %v1550_v26 = vpack.c.bf16 %v919_v18, %v919_v18  ;;  %v693_v27 = vpop.f32.mrf.mxu0  ;;  %v821_v28 = vpop.f32.mrf.mxu1 }
 0x108   : > { %v1516_v29 = vpack.c.bf16 %v885_v21, %v885_v21  ;;  %v888_v31 = vmax.f32 %v702_v23, 0.0  ;;  %v920_v32 = vmax.f32 %v830_v24, 0.0  ;;  %v694_v33 = vadd.f32 %v1871_v38, %v693_v27 }
 0x109   : > { %v1548_v30 = vpack.c.bf16 %v917_v22, %v917_v22  ;;  %1208 = vst.msk [vmem:[%s1882_s29 + $0x58] sm:$0xf] %vm1185_vm3, %v1518_v25  ;;  %1240 = vst.msk [vmem:[%s1882_s29 + $0xd8] sm:$0xf] %vm1185_vm3, %v1550_v26  ;;  %v822_v34 = vadd.f32 %v1871_v38, %v821_v28  ;;  %v1624_v35 = vpop.f32.mrf.mxu0  ;;  %v1656_v36 = vpop.f32.mrf.mxu1 }
 0x10a   : > { %1206 = vst.msk [vmem:[%s1882_s29 + $0x50] sm:$0xf] %vm1185_vm3, %v1516_v29  ;;  %v1519_v37 = vpack.c.bf16 %v888_v31, %v888_v31  ;;  %v1551_v39 = vpack.c.bf16 %v920_v32, %v920_v32  ;;  %v715_v40 = vadd.f32 %v1624_v35, %v1871_v38  ;;  %v843_v41 = vadd.f32 %v1656_v36, %v1871_v38 }
 0x10b   : > { %1238 = vst.msk [vmem:[%s1882_s29 + $0xd0] sm:$0xf] %vm1185_vm3, %v1548_v30  ;;  %v886_v42 = vmax.f32 %v694_v33, 0.0  ;;  %v918_v43 = vmax.f32 %v822_v34, 0.0  ;;  %v706_v44 = vpop.f32.mrf.mxu0  ;;  %v834_v45 = vpop.f32.mrf.mxu1 }
 0x10c   : > { %1209 = vst.msk [vmem:[%s1882_s29 + $0x5c] sm:$0xf] %vm1185_vm3, %v1519_v37  ;;  %1241 = vst.msk [vmem:[%s1882_s29 + $0xdc] sm:$0xf] %vm1185_vm3, %v1551_v39  ;;  %v891_v46 = vmax.f32 %v715_v40, 0.0  ;;  %v923_v47 = vmax.f32 %v843_v41, 0.0  ;;  %v707_v48 = vadd.f32 %v1871_v38, %v706_v44  ;;  %v835_v49 = vadd.f32 %v1871_v38, %v834_v45 }
 0x10d   : > { %v1517_v50 = vpack.c.bf16 %v886_v42, %v886_v42  ;;  %v1549_v51 = vpack.c.bf16 %v918_v43, %v918_v43  ;;  %v1625_v52 = vpop.f32.mrf.mxu0  ;;  %v1657_v53 = vpop.f32.mrf.mxu1 }
 0x10e   : > { %v1522_v54 = vpack.c.bf16 %v891_v46, %v891_v46  ;;  %v1554_v55 = vpack.c.bf16 %v923_v47, %v923_v47  ;;  %v889_v56 = vmax.f32 %v707_v48, 0.0  ;;  %v921_v57 = vmax.f32 %v835_v49, 0.0 }
 0x10f   : > { %1207 = vst.msk [vmem:[%s1882_s29 + $0x54] sm:$0xf] %vm1185_vm3, %v1517_v50  ;;  %1239 = vst.msk [vmem:[%s1882_s29 + $0xd4] sm:$0xf] %vm1185_vm3, %v1549_v51  ;;  %v718_v58 = vadd.f32 %v1625_v52, %v1871_v38  ;;  %v846_v59 = vadd.f32 %v1657_v53, %v1871_v38  ;;  %v709_v60 = vpop.f32.mrf.mxu0  ;;  %v837_v61 = vpop.f32.mrf.mxu1 }
 0x110   : > { %1212 = vst.msk [vmem:[%s1882_s29 + $0x68] sm:$0xf] %vm1185_vm3, %v1522_v54  ;;  %1244 = vst.msk [vmem:[%s1882_s29 + $0xe8] sm:$0xf] %vm1185_vm3, %v1554_v55  ;;  %v1520_v62 = vpack.c.bf16 %v889_v56, %v889_v56  ;;  %v1552_v63 = vpack.c.bf16 %v921_v57, %v921_v57  ;;  %v710_v0 = vadd.f32 %v1871_v38, %v709_v60 }
 0x111   : > { %v838_v1 = vadd.f32 %v1871_v38, %v837_v61  ;;  %v892_v2 = vmax.f32 %v718_v58, 0.0  ;;  %v924_v3 = vmax.f32 %v846_v59, 0.0  ;;  %v1628_v4 = vpop.f32.mrf.mxu0  ;;  %v1660_v5 = vpop.f32.mrf.mxu1 }
 0x112   : > { %1210 = vst.msk [vmem:[%s1882_s29 + $0x60] sm:$0xf] %vm1185_vm3, %v1520_v62  ;;  %1242 = vst.msk [vmem:[%s1882_s29 + $0xe0] sm:$0xf] %vm1185_vm3, %v1552_v63  ;;  %v890_v6 = vmax.f32 %v710_v0, 0.0  ;;  %v731_v8 = vadd.f32 %v1628_v4, %v1871_v38  ;;  %v859_v9 = vadd.f32 %v1660_v5, %v1871_v38 }
 0x113   : > { %v922_v7 = vmax.f32 %v838_v1, 0.0  ;;  %v1523_v10 = vpack.c.bf16 %v892_v2, %v892_v2  ;;  %v1555_v11 = vpack.c.bf16 %v924_v3, %v924_v3  ;;  %v722_v12 = vpop.f32.mrf.mxu0  ;;  %v850_v13 = vpop.f32.mrf.mxu1 }
 0x114   : > { %v1521_v14 = vpack.c.bf16 %v890_v6, %v890_v6  ;;  %v895_v16 = vmax.f32 %v731_v8, 0.0  ;;  %v927_v17 = vmax.f32 %v859_v9, 0.0  ;;  %v723_v18 = vadd.f32 %v1871_v38, %v722_v12 }
 0x115   : > { %v1553_v15 = vpack.c.bf16 %v922_v7, %v922_v7  ;;  %1213 = vst.msk [vmem:[%s1882_s29 + $0x6c] sm:$0xf] %vm1185_vm3, %v1523_v10  ;;  %1245 = vst.msk [vmem:[%s1882_s29 + $0xec] sm:$0xf] %vm1185_vm3, %v1555_v11  ;;  %v851_v19 = vadd.f32 %v1871_v38, %v850_v13  ;;  %v1629_v20 = vpop.f32.mrf.mxu0  ;;  %v1661_v21 = vpop.f32.mrf.mxu1 }
 0x116   : > { %1211 = vst.msk [vmem:[%s1882_s29 + $0x64] sm:$0xf] %vm1185_vm3, %v1521_v14  ;;  %v1526_v22 = vpack.c.bf16 %v895_v16, %v895_v16  ;;  %v1558_v23 = vpack.c.bf16 %v927_v17, %v927_v17  ;;  %v734_v24 = vadd.f32 %v1629_v20, %v1871_v38  ;;  %v862_v25 = vadd.f32 %v1661_v21, %v1871_v38 }
 0x117   : > { %1243 = vst.msk [vmem:[%s1882_s29 + $0xe4] sm:$0xf] %vm1185_vm3, %v1553_v15  ;;  %v893_v26 = vmax.f32 %v723_v18, 0.0  ;;  %v925_v27 = vmax.f32 %v851_v19, 0.0  ;;  %v725_v28 = vpop.f32.mrf.mxu0  ;;  %v853_v29 = vpop.f32.mrf.mxu1 }
 0x118   : > { %1216 = vst.msk [vmem:[%s1882_s29 + $0x78] sm:$0xf] %vm1185_vm3, %v1526_v22  ;;  %1248 = vst.msk [vmem:[%s1882_s29 + $0xf8] sm:$0xf] %vm1185_vm3, %v1558_v23  ;;  %v896_v30 = vmax.f32 %v734_v24, 0.0  ;;  %v928_v31 = vmax.f32 %v862_v25, 0.0  ;;  %v726_v32 = vadd.f32 %v1871_v38, %v725_v28  ;;  %v854_v33 = vadd.f32 %v1871_v38, %v853_v29 }
 0x119   : > { %v1524_v34 = vpack.c.bf16 %v893_v26, %v893_v26  ;;  %v1556_v35 = vpack.c.bf16 %v925_v27, %v925_v27 }
 0x11a   : > { %v1527_v36 = vpack.c.bf16 %v896_v30, %v896_v30  ;;  %v1559_v37 = vpack.c.bf16 %v928_v31, %v928_v31  ;;  %v894_v39 = vmax.f32 %v726_v32, 0.0  ;;  %v926_v40 = vmax.f32 %v854_v33, 0.0 }
 0x11b   : > { %1214 = vst.msk [vmem:[%s1882_s29 + $0x70] sm:$0xf] %vm1185_vm3, %v1524_v34  ;;  %1246 = vst.msk [vmem:[%s1882_s29 + $0xf0] sm:$0xf] %vm1185_vm3, %v1556_v35 }
 0x11c   : > { %1217 = vst.msk [vmem:[%s1882_s29 + $0x7c] sm:$0xf] %vm1185_vm3, %v1527_v36  ;;  %1249 = vst.msk [vmem:[%s1882_s29 + $0xfc] sm:$0xf] %vm1185_vm3, %v1559_v37  ;;  %v1525_v41 = vpack.c.bf16 %v894_v39, %v894_v39  ;;  %v1557_v42 = vpack.c.bf16 %v926_v40, %v926_v40 }
 0x11e   : > { %1215 = vst.msk [vmem:[%s1882_s29 + $0x74] sm:$0xf] %vm1185_vm3, %v1525_v41  ;;  %1247 = vst.msk [vmem:[%s1882_s29 + $0xf4] sm:$0xf] %vm1185_vm3, %v1557_v42 }
 0x11f PF: > { %s13_s14 = sadd.s32 1, %s1747_s14   ;;  %s2085_s12 = smov %s1743_s13 }
 0x120   : > { %p10_p5 = scmp.ge.s32.totalorder %s13_s14, 6   ;;  %s2086_s13 = smov %s2088_s15 }
 0x122   :  { %12 = sbr.rel (!%p10_p5) target bundleno = 2 (0x2), region = 68 }

</bundles_post_ra>
